<compile_context>
chip_gen: v7x
topology: tpu7x:2x2x1
jax: 0.10.0
libtpu: 0.0.40
codegen_flags: <defaults>
</compile_context>

<pallas_src>
import math

import jax
import jax.numpy as jnp
from jax.experimental import pallas as pl
from jax.experimental.pallas import tpu as pltpu


# ---------------------------------------------------------------------------
# Fused kernel:  grid = (B, V // TV)
#   v-tile 0 : enc = relu(det @ W_enc + b_enc)
#              q   = (emb @ Wq) / sqrt(H) ; [k|v] = enc @ Wkv
#              h   = emb + softmax(q k^T) v        (stored in VMEM scratch)
#   every v  : logits[:, v*TV:(v+1)*TV] = h @ Wo_tile + bo_tile
# ---------------------------------------------------------------------------
def _aic_fused_kernel(det_ref, emb_ref, wenc_ref, benc_ref, wq_ref, wkv_ref,
                      wo_ref, bo_ref, o_ref, h_ref):
    H = wq_ref.shape[1]

    @pl.when(pl.program_id(1) == 0)
    def _compute_attention():
        # --- frozen encoder: relu(det @ W_enc + b_enc) --------------------
        det = det_ref[...].astype(jnp.bfloat16)                      # (N, D)
        enc = jnp.dot(det, wenc_ref[...],
                      preferred_element_type=jnp.float32)            # (N, H) f32
        enc = jnp.maximum(enc + benc_ref[...], 0.0)

        # --- cross attention ----------------------------------------------
        emb = emb_ref[...]                                           # (T, H) bf16
        scale = 1.0 / math.sqrt(H)
        q = jnp.dot(emb, wq_ref[...],
                    preferred_element_type=jnp.float32) * scale      # (T, H) f32
        kv = jnp.dot(enc.astype(jnp.bfloat16), wkv_ref[...],
                     preferred_element_type=jnp.float32)             # (N, 2H) f32
        k = kv[:, :H]
        v = kv[:, H:]

        s = jnp.dot(q.astype(jnp.bfloat16), k.astype(jnp.bfloat16).T,
                    preferred_element_type=jnp.float32)              # (T, N)
        m = jnp.max(s, axis=-1, keepdims=True)
        p = jnp.exp(s - m)
        denom = jnp.sum(p, axis=-1, keepdims=True)
        attn = p * pl.reciprocal(denom, approx=True)

        ctx = jnp.dot(attn.astype(jnp.bfloat16), v.astype(jnp.bfloat16),
                      preferred_element_type=jnp.float32)            # (T, H)
        h_ref[...] = emb.astype(jnp.float32) + ctx                   # residual

    # --- vocab projection for this V tile (runs every grid step) ----------
    h = h_ref[...].astype(jnp.bfloat16)                              # (T, H)
    logits = jnp.dot(h, wo_ref[...],
                     preferred_element_type=jnp.float32)             # (T, TV)
    o_ref[...] = logits + bo_ref[...]


def aic_forward(detection, captions, params, *, v_tile=256):
    """detection: f32 [B, N, D_det], captions: int32 [B, T] -> logits f32 [B, T, V]."""
    B, N, D = detection.shape
    T = captions.shape[1]
    H = params["wq"].shape[1]
    V = params["wo"].shape[1]
    tv = min(v_tile, V)
    assert V % tv == 0, "vocab size must be divisible by the vocab tile"

    # Glue: token-embedding gather (plain JAX; no clean single-kernel win here).
    emb = jnp.take(params["embed"], captions, axis=0)                # (B, T, H) bf16

    grid = (B, V // tv)
    out = pl.pallas_call(
        _aic_fused_kernel,
        out_shape=jax.ShapeDtypeStruct((B, T, V), jnp.float32),
        grid=grid,
        in_specs=[
            pl.BlockSpec((None, N, D), lambda b, v: (b, 0, 0)),      # det    (N, D)
            pl.BlockSpec((None, T, H), lambda b, v: (b, 0, 0)),      # emb    (T, H)
            pl.BlockSpec((D, H),       lambda b, v: (0, 0)),         # W_enc
            pl.BlockSpec((1, H),       lambda b, v: (0, 0)),         # b_enc
            pl.BlockSpec((H, H),       lambda b, v: (0, 0)),         # Wq
            pl.BlockSpec((H, 2 * H),   lambda b, v: (0, 0)),         # Wkv = [Wk|Wv]
            pl.BlockSpec((H, tv),      lambda b, v: (0, v)),         # Wo tile
            pl.BlockSpec((1, tv),      lambda b, v: (0, v)),         # bo tile
        ],
        out_specs=pl.BlockSpec((None, T, tv), lambda b, v: (b, 0, v)),
        scratch_shapes=[pltpu.VMEM((T, H), jnp.float32)],            # h = emb + ctx
        compiler_params=pltpu.CompilerParams(
            dimension_semantics=("parallel", "arbitrary"),
            vmem_limit_bytes=32 * 1024 * 1024),
    )(detection, emb,
      params["w_enc"], params["b_enc"].reshape(1, H),
      params["wq"], params["wkv"],
      params["wo"], params["bo"].reshape(1, V))
    return out


def init_params(key, D_det, H, V):
    ks = jax.random.split(key, 5)
    s = 0.02
    wdt = jnp.bfloat16  # weights / embedding in bf16; biases stay f32
    return {
        # frozen encoder (forward-only, so "frozen" is implicit)
        "w_enc": (s * jax.random.normal(ks[0], (D_det, H), jnp.float32)).astype(wdt),
        "b_enc": jnp.zeros((H,), jnp.float32),
        # decoder
        "embed": (s * jax.random.normal(ks[1], (V, H), jnp.float32)).astype(wdt),
        "wq":    (s * jax.random.normal(ks[2], (H, H), jnp.float32)).astype(wdt),
        "wkv":   (s * jax.random.normal(ks[3], (H, 2 * H), jnp.float32)).astype(wdt),
        "wo":    (s * jax.random.normal(ks[4], (H, V), jnp.float32)).astype(wdt),
        "bo":    jnp.zeros((V,), jnp.float32),
    }


if __name__ == "__main__":
    # Small but lane-aligned shapes: last dims are multiples of 128, T mult of 8.
    B, N_det, D_det, H, T, V = 2, 128, 128, 128, 16, 512

    key = jax.random.PRNGKey(0)
    k_det, k_cap, k_par = jax.random.split(key, 3)

    detection = jax.random.normal(k_det, (B, N_det, D_det), jnp.float32)
    captions = jax.random.randint(k_cap, (B, T), 0, V, dtype=jnp.int32)
    params = init_params(k_par, D_det, H, V)

    logits = jax.jit(aic_forward)(detection, captions, params)
    jax.block_until_ready(logits)

    assert logits.shape == (B, T, V), logits.shape
    assert logits.dtype == jnp.float32
    print("KERNEL_OK")
</pallas_src>

<mosaic_0001>
module attributes {stable_mosaic.version = 11 : i64} {
  func.func @_aic_fused_kernel(%arg0: i32, %arg1: i32, %arg2: memref<1x128x128xf32, #tpu.memory_space<vmem>>, %arg3: memref<1x16x128xbf16, #tpu.memory_space<vmem>>, %arg4: memref<128x128xbf16, #tpu.memory_space<vmem>>, %arg5: memref<1x128xf32, #tpu.memory_space<vmem>>, %arg6: memref<128x128xbf16, #tpu.memory_space<vmem>>, %arg7: memref<128x256xbf16, #tpu.memory_space<vmem>>, %arg8: memref<128x256xbf16, #tpu.memory_space<vmem>>, %arg9: memref<1x256xf32, #tpu.memory_space<vmem>>, %arg10: memref<1x16x256xf32, #tpu.memory_space<vmem>>, %arg11: memref<16x128xf32, #tpu.memory_space<vmem>>) attributes {dimension_semantics = [#tpu.dimension_semantics<parallel>, #tpu.dimension_semantics<arbitrary>], iteration_bounds = array<i64: 2, 2>, scalar_prefetch = 0 : i64, scratch_operands = 1 : i64, tpu.core_type = #tpu.core_type<tc>, window_params = [{transform_indices = @transform_0, window_bounds = array<i64: 1, 128, 128>}, {transform_indices = @transform_1, window_bounds = array<i64: 1, 16, 128>}, {pipeline_mode = #tpu.pipeline_mode<synchronous>, transform_indices = @transform_2, window_bounds = array<i64: 128, 128>}, {pipeline_mode = #tpu.pipeline_mode<synchronous>, transform_indices = @transform_3, window_bounds = array<i64: 1, 128>}, {pipeline_mode = #tpu.pipeline_mode<synchronous>, transform_indices = @transform_4, window_bounds = array<i64: 128, 128>}, {pipeline_mode = #tpu.pipeline_mode<synchronous>, transform_indices = @transform_5, window_bounds = array<i64: 128, 256>}, {transform_indices = @transform_6, window_bounds = array<i64: 128, 256>}, {transform_indices = @transform_7, window_bounds = array<i64: 1, 256>}, {transform_indices = @transform_8, window_bounds = array<i64: 1, 16, 256>}]} {
    %c0_i32 = arith.constant 0 : i32
    %0 = arith.cmpi eq, %arg1, %c0_i32 : i32
    %1 = arith.extui %0 : i1 to i32
    %c0_i32_0 = arith.constant 0 : i32
    %2 = arith.cmpi ne, %1, %c0_i32_0 : i32
    scf.if %2 {
      %c0_9 = arith.constant 0 : index
      %c0_10 = arith.constant 0 : index
      %c0_11 = arith.constant 0 : index
      %13 = vector.load %arg2[%c0_9, %c0_10, %c0_11] : memref<1x128x128xf32, #tpu.memory_space<vmem>>, vector<1x128x128xf32>
      %14 = vector.shape_cast %13 : vector<1x128x128xf32> to vector<128x128xf32>
      %15 = arith.truncf %14 : vector<128x128xf32> to vector<128x128xbf16>
      %c0_12 = arith.constant 0 : index
      %c0_13 = arith.constant 0 : index
      %16 = vector.load %arg4[%c0_12, %c0_13] : memref<128x128xbf16, #tpu.memory_space<vmem>>, vector<128x128xbf16>
      %cst_14 = arith.constant dense<0.000000e+00> : vector<128x128xf32>
      %17 = tpu.matmul %15, %16, %cst_14 {dimension_numbers = #tpu.dot_dimension_numbers<[1], [0], [0], [1], [0, 0, 1, 1], [], []>} : vector<128x128xbf16>, vector<128x128xbf16>, vector<128x128xf32> -> vector<128x128xf32>
      %c0_15 = arith.constant 0 : index
      %c0_16 = arith.constant 0 : index
      %18 = vector.load %arg5[%c0_15, %c0_16] : memref<1x128xf32, #tpu.memory_space<vmem>>, vector<1x128xf32>
      %19 = vector.broadcast %18 : vector<1x128xf32> to vector<128x128xf32>
      %20 = arith.addf %17, %19 : vector<128x128xf32>
      %cst_17 = arith.constant 0.000000e+00 : f32
      %21 = vector.broadcast %cst_17 : f32 to vector<128x128xf32>
      %22 = arith.maximumf %20, %21 : vector<128x128xf32>
      %c0_18 = arith.constant 0 : index
      %c0_19 = arith.constant 0 : index
      %c0_20 = arith.constant 0 : index
      %23 = vector.load %arg3[%c0_18, %c0_19, %c0_20] : memref<1x16x128xbf16, #tpu.memory_space<vmem>>, vector<1x16x128xbf16>
      %24 = vector.shape_cast %23 : vector<1x16x128xbf16> to vector<16x128xbf16>
      %c0_21 = arith.constant 0 : index
      %c0_22 = arith.constant 0 : index
      %25 = vector.load %arg6[%c0_21, %c0_22] : memref<128x128xbf16, #tpu.memory_space<vmem>>, vector<128x128xbf16>
      %cst_23 = arith.constant dense<0.000000e+00> : vector<16x128xf32>
      %26 = tpu.matmul %24, %25, %cst_23 {dimension_numbers = #tpu.dot_dimension_numbers<[1], [0], [0], [1], [0, 0, 1, 1], [], []>} : vector<16x128xbf16>, vector<128x128xbf16>, vector<16x128xf32> -> vector<16x128xf32>
      %cst_24 = arith.constant 0.0883883461 : f32
      %27 = vector.broadcast %cst_24 : f32 to vector<16x128xf32>
      %28 = arith.mulf %26, %27 : vector<16x128xf32>
      %29 = arith.truncf %22 : vector<128x128xf32> to vector<128x128xbf16>
      %c0_25 = arith.constant 0 : index
      %c0_26 = arith.constant 0 : index
      %30 = vector.load %arg7[%c0_25, %c0_26] : memref<128x256xbf16, #tpu.memory_space<vmem>>, vector<128x256xbf16>
      %cst_27 = arith.constant dense<0.000000e+00> : vector<128x256xf32>
      %31 = tpu.matmul %29, %30, %cst_27 {dimension_numbers = #tpu.dot_dimension_numbers<[1], [0], [0], [1], [0, 0, 1, 1], [], []>} : vector<128x128xbf16>, vector<128x256xbf16>, vector<128x256xf32> -> vector<128x256xf32>
      %32 = vector.extract_strided_slice %31 {offsets = [0, 0], sizes = [128, 128], strides = [1, 1]} : vector<128x256xf32> to vector<128x128xf32>
      %33 = vector.extract_strided_slice %31 {offsets = [0, 128], sizes = [128, 128], strides = [1, 1]} : vector<128x256xf32> to vector<128x128xf32>
      %34 = arith.truncf %28 : vector<16x128xf32> to vector<16x128xbf16>
      %35 = arith.truncf %32 : vector<128x128xf32> to vector<128x128xbf16>
      %36 = tpu.transpose %35, [1, 0] : vector<128x128xbf16> -> vector<128x128xbf16>
      %cst_28 = arith.constant dense<0.000000e+00> : vector<16x128xf32>
      %37 = tpu.matmul %34, %36, %cst_28 {dimension_numbers = #tpu.dot_dimension_numbers<[1], [0], [0], [1], [0, 0, 1, 1], [], []>} : vector<16x128xbf16>, vector<128x128xbf16>, vector<16x128xf32> -> vector<16x128xf32>
      %cst_29 = arith.constant dense<0xFF800000> : vector<16xf32>
      %38 = vector.multi_reduction <maximumf>, %37, %cst_29 [1] : vector<16x128xf32> to vector<16xf32>
      %39 = vector.shape_cast %38 : vector<16xf32> to vector<16x1xf32>
      %40 = vector.broadcast %39 : vector<16x1xf32> to vector<16x128xf32>
      %41 = arith.subf %37, %40 : vector<16x128xf32>
      %42 = math.exp %41 : vector<16x128xf32>
      %cst_30 = arith.constant dense<0.000000e+00> : vector<16xf32>
      %43 = vector.multi_reduction <add>, %42, %cst_30 [1] : vector<16x128xf32> to vector<16xf32>
      %44 = vector.shape_cast %43 : vector<16xf32> to vector<16x1xf32>
      %45 = tpu.reciprocal %44 {approx = true} : vector<16x1xf32> -> vector<16x1xf32>
      %46 = vector.broadcast %45 : vector<16x1xf32> to vector<16x128xf32>
      %47 = arith.mulf %42, %46 : vector<16x128xf32>
      %48 = arith.truncf %47 : vector<16x128xf32> to vector<16x128xbf16>
      %49 = arith.truncf %33 : vector<128x128xf32> to vector<128x128xbf16>
      %cst_31 = arith.constant dense<0.000000e+00> : vector<16x128xf32>
      %50 = tpu.matmul %48, %49, %cst_31 {dimension_numbers = #tpu.dot_dimension_numbers<[1], [0], [0], [1], [0, 0, 1, 1], [], []>} : vector<16x128xbf16>, vector<128x128xbf16>, vector<16x128xf32> -> vector<16x128xf32>
      %51 = arith.extf %24 : vector<16x128xbf16> to vector<16x128xf32>
      %52 = arith.addf %51, %50 : vector<16x128xf32>
      %c0_32 = arith.constant 0 : index
      %c0_33 = arith.constant 0 : index
      %53 = vector.load %arg11[%c0_32, %c0_33] : memref<16x128xf32, #tpu.memory_space<vmem>>, vector<16x128xf32>
      tpu.vector_store %arg11[%c0_32, %c0_33], %52 {strides = array<i32>} : memref<16x128xf32, #tpu.memory_space<vmem>>, vector<16x128xf32>,
    } else {
    }
    %c0 = arith.constant 0 : index
    %c0_1 = arith.constant 0 : index
    %3 = vector.load %arg11[%c0, %c0_1] : memref<16x128xf32, #tpu.memory_space<vmem>>, vector<16x128xf32>
    %4 = arith.truncf %3 : vector<16x128xf32> to vector<16x128xbf16>
    %c0_2 = arith.constant 0 : index
    %c0_3 = arith.constant 0 : index
    %5 = vector.load %arg8[%c0_2, %c0_3] : memref<128x256xbf16, #tpu.memory_space<vmem>>, vector<128x256xbf16>
    %cst = arith.constant dense<0.000000e+00> : vector<16x256xf32>
    %6 = tpu.matmul %4, %5, %cst {dimension_numbers = #tpu.dot_dimension_numbers<[1], [0], [0], [1], [0, 0, 1, 1], [], []>} : vector<16x128xbf16>, vector<128x256xbf16>, vector<16x256xf32> -> vector<16x256xf32>
    %c0_4 = arith.constant 0 : index
    %c0_5 = arith.constant 0 : index
    %7 = vector.load %arg9[%c0_4, %c0_5] : memref<1x256xf32, #tpu.memory_space<vmem>>, vector<1x256xf32>
    %8 = vector.broadcast %7 : vector<1x256xf32> to vector<16x256xf32>
    %9 = arith.addf %6, %8 : vector<16x256xf32>
    %c0_6 = arith.constant 0 : index
    %c0_7 = arith.constant 0 : index
    %c0_8 = arith.constant 0 : index
    %10 = vector.load %arg10[%c0_6, %c0_7, %c0_8] : memref<1x16x256xf32, #tpu.memory_space<vmem>>, vector<1x16x256xf32>
    %11 = vector.shape_cast %10 : vector<1x16x256xf32> to vector<16x256xf32>
    %12 = vector.shape_cast %9 : vector<16x256xf32> to vector<1x16x256xf32>
    tpu.vector_store %arg10[%c0_6, %c0_7, %c0_8], %12 {strides = array<i32>} : memref<1x16x256xf32, #tpu.memory_space<vmem>>, vector<1x16x256xf32>,
    return
  }
  func.func @transform_0(%arg0: i32, %arg1: i32) -> (i32, i32, i32) {
    %c0_i32 = arith.constant 0 : i32
    %c0_i32_0 = arith.constant 0 : i32
    %c0_i32_1 = arith.constant 0 : i32
    return %arg0, %c0_i32, %c0_i32_0 : i32, i32, i32
  }
  func.func @transform_1(%arg0: i32, %arg1: i32) -> (i32, i32, i32) {
    %c0_i32 = arith.constant 0 : i32
    %c0_i32_0 = arith.constant 0 : i32
    %c0_i32_1 = arith.constant 0 : i32
    return %arg0, %c0_i32, %c0_i32_0 : i32, i32, i32
  }
  func.func @transform_2(%arg0: i32, %arg1: i32) -> (i32, i32) {
    %c0_i32 = arith.constant 0 : i32
    %c0_i32_0 = arith.constant 0 : i32
    %c0_i32_1 = arith.constant 0 : i32
    return %c0_i32, %c0_i32_0 : i32, i32
  }
  func.func @transform_3(%arg0: i32, %arg1: i32) -> (i32, i32) {
    %c0_i32 = arith.constant 0 : i32
    %c0_i32_0 = arith.constant 0 : i32
    %c0_i32_1 = arith.constant 0 : i32
    return %c0_i32, %c0_i32_0 : i32, i32
  }
  func.func @transform_4(%arg0: i32, %arg1: i32) -> (i32, i32) {
    %c0_i32 = arith.constant 0 : i32
    %c0_i32_0 = arith.constant 0 : i32
    %c0_i32_1 = arith.constant 0 : i32
    return %c0_i32, %c0_i32_0 : i32, i32
  }
  func.func @transform_5(%arg0: i32, %arg1: i32) -> (i32, i32) {
    %c0_i32 = arith.constant 0 : i32
    %c0_i32_0 = arith.constant 0 : i32
    %c0_i32_1 = arith.constant 0 : i32
    return %c0_i32, %c0_i32_0 : i32, i32
  }
  func.func @transform_6(%arg0: i32, %arg1: i32) -> (i32, i32) {
    %c0_i32 = arith.constant 0 : i32
    %c0_i32_0 = arith.constant 0 : i32
    return %c0_i32, %arg1 : i32, i32
  }
  func.func @transform_7(%arg0: i32, %arg1: i32) -> (i32, i32) {
    %c0_i32 = arith.constant 0 : i32
    %c0_i32_0 = arith.constant 0 : i32
    return %c0_i32, %arg1 : i32, i32
  }
  func.func @transform_8(%arg0: i32, %arg1: i32) -> (i32, i32, i32) {
    %c0_i32 = arith.constant 0 : i32
    %c0_i32_0 = arith.constant 0 : i32
    return %arg0, %c0_i32, %arg1 : i32, i32, i32
  }
}

</mosaic_0001>

<bundles_post_ra>
// kernel: aic_forward.1
= control target key start
LH: loop header
LB: loop body
LE: loop exit
PB: predicated region body
PF: predicated region fallthrough
CT: control target
= control target key end

     0   :  { %s2743_s0 = inlined_call_operand.hbm [shape: f32[2,128,128], index: 0, kind: input, shape index: {}]   ;;  %s2744_s1 = inlined_call_operand.vmem [shape: bf16[2,16,128], index: 1, kind: input, shape index: {}]   ;;  %s2745_s2 = inlined_call_operand.vmem [shape: bf16[128,128], index: 2, kind: input, shape index: {}]   ;;  %s2746_s3 = inlined_call_operand.vmem [shape: f32[1,128], index: 3, kind: input, shape index: {}]   ;;  %s2747_s4 = inlined_call_operand.hbm [shape: bf16[128,128], index: 4, kind: input, shape index: {}]   ;;  %s2748_s5 = inlined_call_operand.vmem [shape: bf16[128,256], index: 5, kind: input, shape index: {}]   ;;  %s2749_s6 = inlined_call_operand.hbm [shape: bf16[128,512], index: 6, kind: input, shape index: {}]   ;;  %s2750_s7 = inlined_call_operand.vmem [shape: f32[1,512], index: 7, kind: input, shape index: {}]   ;;  %s2751_s8 = inlined_call_operand.hbm [shape: f32[2,16,512], index: 8, kind: output, shape index: {}]  }
   0x1   :  { %2775 = sst [smem:[#allocation25_spill]] %s2743_s0 }
   0x2   :  { %2776 = sst [smem:[#allocation26_spill]] %s2744_s1 }
   0x3   :  { %2777 = sst [smem:[#allocation27_spill]] %s2745_s2 }
   0x4   :  { %2778 = sst [smem:[#allocation28_spill]] %s2746_s3 }
   0x5   :  { %2779 = sst [smem:[#allocation29_spill]] %s2747_s4 }
   0x6   :  { %2780 = sst [smem:[#allocation30_spill]] %s2748_s5 }
   0x7   :  { %2781 = sst [smem:[#allocation31_spill]] %s2749_s6 }
   0x8   :  { %2782 = sst [smem:[#allocation32_spill]] %s2750_s7 }
   0x9   :  { %2783 = sst [smem:[#allocation33_spill]] %s2751_s8 }
   0xa   :  { %13 = vsyncpa [#allocation4], 0 }
   0xb   :  { %15 = vsyncpa [#allocation4 + $0x1], 0 }
   0xc   :  { %16 = vsyncpa [#allocation7], 0 }
   0xd   :  { %17 = vsyncpa [#allocation5], 0 }
   0xe   :  { %19 = vsyncpa [#allocation5 + $0x1], 0  ;;  %s2159_s27 = smov 0   ;;  %s2161_s28 = smov 0  }
   0xf   :  { %s2163_s29 = smov 0   ;;  %s2165_s30 = smov 0  }
  0x10   :  { %s2167_s9 = smov 0   ;;  %s2169_s10 = smov 0  }
  0x11   :  { %s2171_s11 = smov 0   ;;  %s2173_s12 = smov 0  }
  0x12   :  { %s2175_s13 = smov 0   ;;  %s2177_s14 = smov 0  }
  0x13   :  { %s2179_s15 = smov 0   ;;  %s2181_s16 = smov 0  }
  0x14   :  { %s2183_s17 = smov 0   ;;  %s2185_s18 = smov 0  }
  0x15 LB: > { %2784 = sst [smem:[#allocation14_spill]] %s2064_s10  ;;  %s34_s19 = sadd.s32 1, %s2088_s16  ;;  %s2096_s18 = sphi %s2185_s18, %s25_s18   ;;  %s2092_s17 = sphi %s2183_s17, %s2843_s17   ;;  %s2088_s16 = sphi %s2181_s16, %s2842_s16   ;;  %s2084_s15 = sphi %s2179_s15, %s2841_s15   ;;  %s2080_s14 = sphi %s2177_s14, %s2840_s14   ;;  %s2076_s13 = sphi %s2175_s13, %s2839_s13   ;;  %s2072_s12 = sphi %s2173_s12, %s2850_s12   ;;  %s2068_s11 = sphi %s2171_s11, %s2849_s11   ;;  %s2064_s10 = sphi %s2169_s10, %s2837_s10   ;;  %s2060_s9 = sphi %s2167_s9, %s2848_s9   ;;  %s2056_s30 = sphi %s2165_s30, %s2847_s30   ;;  %s2052_s29 = sphi %s2163_s29, %s2846_s29   ;;  %s2048_s28 = sphi %s2161_s28, %s2845_s28   ;;  %s2044_s27 = sphi %s2159_s27, %s2844_s27  }
  0x16   : > { %2785 = sst [smem:[#allocation15_spill]] %s2076_s13  ;;  %s37_s20 = sadd.s32 1, %s2092_s17 }
  0x17   : > { %2786 = sst [smem:[#allocation16_spill]] %s2080_s14  ;;  %p35_p0 = scmp.ge.s32.totalorder %s34_s19, 2 }
  0x18   : > { %2787 = sst [smem:[#allocation17_spill]] %s2084_s15  ;;  %s44_s21 = sadd.s32 1, %s2076_s13 }
  0x19   : > { %2788 = sst [smem:[#allocation18_spill]] %s2088_s16  ;;  %p51_p1 = scmp.ne.s32.totalorder %s2076_s13, %s2072_s12 }
  0x1a   : > { %2789 = sst [smem:[#allocation19_spill]] %s2092_s17  ;;  %p2761_p2 = scmp.eq.s32.totalorder %s2096_s18, 0 }
  0x1b   : > { %s2852_s19 = smov (%p35_p0, %s34_s19), 0  ;;  %s2854_s20 = smov (!%p35_p0, %s37_s20), %s2092_s17 }
  0x1c   : > { %2790 = sst [smem:[#allocation20_spill]] %s2852_s19  ;;  %p2240_p3 = por %p2761_p2, %p51_p1 }
  0x1d   : > { %s2246_s23 = ssub.s32 %s2088_s16, %s2852_s19  ;;  %p39_p4 = scmp.ge.s32.totalorder %s2854_s20, 2 }
  0x1e   : > { %p178_p5 = scmp.eq.s32.totalorder %s2246_s23, 0  ;;  %s234_s24 = sadd.s32 1, %s2052_s29 }
  0x1f   : > { %s2856_s20 = smov (%p39_p4, %s2854_s20), 0  ;;  %p2760_p6 = scmp.lt.s32.totalorder %s2096_s18, 4 }
  0x20   : > { %2792 = sst [smem:[#allocation21_spill]] %s2856_s20  ;;  %s293_s25 = sand.u32 1, %s2096_s18  }
  0x21   : > { %s41_s26 = ssub.s32 %s2092_s17, %s2856_s20  ;;  %s295_s3 = sand.u32 1, %s2076_s13  }
  0x22   : > { %p42_p7 = scmp.eq.s32.totalorder %s41_s26, 0  ;;  %s231_s8 = sor.u32 %s2246_s23, %s41_s26 }
  0x23   : > { %p232_p8 = scmp.eq.s32.totalorder %s231_s8, 0  ;;  %s1417_s2 = sshll.u32 %s295_s3, 7 }
  0x24   : > { %s2259_s5 = scalar_select %p42_p7, %s2076_s13, %s44_s21  }
  0x25   : > { %s2262_s19 = scalar_select %p232_p8, %s2052_s29, %s234_s24  }
  0x26   : > { %2793 = sst [smem:[#allocation22_spill]] %s2259_s5  ;;  %s1488_s7 = sshll.u32 %s2092_s17, 11 }
  0x27   : > { %2794 = sst [smem:[#allocation23_spill]] %s2262_s19  ;;  %s297_s20 = scalar_lea.vmem [#allocation3], %s1417_s2 }
  0x28   : > { %s2795_s0 = sld [smem:[#allocation25_spill]]  ;;  %s304_s6 = sshll.u32 %s297_s20, 4  ;;  %s2278_s6 = int_to_ptr.vmem [resolvable:$true] %s304_s6 }
  0x29   : > { %p2274_p9 = pnand %p2760_p6, %p2240_p3  ;;  %s2280_s3 = scalar_lea.sflag [#allocation4], %s293_s25 }
  0x2b   : > { %p1856_p11 = pneg %p2274_p9 }
  0x2e   : > { %s2268_s15 = scalar_lea.hbm %s2795_s0, %s1488_s7  ;;  %s1859_s14 = scalar_lea.hbm %s2795_s0, 4096 }
  0x2f   : > { %s1854_s1 = scalar_lea.hbm %s2268_s15, 2048  ;;  %p1860_p0 = scmp.lt.u32.totalorder %s2268_s15, %s2795_s0 }
  0x30   : > { %p1855_p10 = scmp.ne.s32.totalorder %s2268_s15, %s1854_s1  ;;  %p1861_p1 = scmp.lt.u32.totalorder %s1859_s14, %s1854_s1 }
  0x31   : > { %p1863_p4 = scmp.lt.u32.totalorder %s1854_s1, %s2268_s15 }
  0x32   : > { %p1857_p12 = pnand %p1856_p11, %p1855_p10  ;;  %p1862_p3 = por %p1861_p1, %p1860_p0 }
  0x34   : > { %p1858_p13 = pneg %p1857_p12  ;;  %p1864_p7 = por %p1863_p4, %p1862_p3 }
  0x36   : > { %p1865_p8 = pnand %p1864_p7, %p1858_p13 }
  0x38   : > { %1868 = shalt.err (!%p1865_p8)
}
  0x39   : > { %s1869_s22 = scalar_lea.vmem %s2278_s6, 2048  ;;  %s2098_s24 = smov [#allocation3]  }
  0x3a   : > { %p1870_p10 = scmp.ne.s32.totalorder %s2278_s6, %s1869_s22  ;;  %s1874_s25 = sshll.u32 %s2098_s24, 4  ;;  %s1875_s25 = int_to_ptr.vmem [resolvable:$false] %s1874_s25 }
  0x3b   : > { %s1876_s26 = scalar_lea.vmem %s1875_s25, 4096  ;;  %p1877_p2 = scmp.lt.s32.totalorder %s2278_s6, %s1875_s25 }
  0x3c   : > { %p1872_p12 = pnand %p1870_p10, %p1856_p11  ;;  %p1878_p0 = scmp.lt.s32.totalorder %s1876_s26, %s1869_s22 }
  0x3e   : > { %p1873_p6 = pneg %p1872_p12  ;;  %p1879_p1 = por %p1878_p0, %p1877_p2 }
  0x40   : > { %p1880_p3 = pnand %p1879_p1, %p1873_p6 }
  0x42   : > { %1883 = shalt.err (!%p1880_p3)
}
  0x43   : > { %s2762_s1 = smov 128   ;;  %s2763_s2 = smov 8  }
  0x44   : > { %1643 = dma.hbm_to_vmem [thread:$0]  (!%p2274_p9), %s2268_s15, 2048, %s2278_s6, %s2280_s3, %s2762_s1, %s2762_s1, %s2763_s2  }
  0x45   : > { %s2312_s7 = sadd.s32 4294967295, %s2096_s18   ;;  %s1413_s14 = sadd.s32 4294967294, %s2096_s18  }
  0x46   : > { %p57_p2 = scmp.ne.s32.totalorder %s2072_s12, %s2068_s11  ;;  %p2766_p6 = scmp.eq.s32.totalorder %s2312_s7, 0 }
  0x47   : > { %s180_s20 = sadd.s32 1, %s2064_s10  ;;  %p187_p11 = scmp.ne.s32.totalorder %s2064_s10, %s2060_s9 }
  0x48   : > { %p2323_p13 = por %p2766_p6, %p57_p2  ;;  %p193_p4 = scmp.ne.s32.totalorder %s2060_s9, %s2056_s30 }
  0x49   : > { %s2332_s6 = scalar_select %p178_p5, %s2064_s10, %s180_s20  }
  0x4a   : > { %s2797_s8 = scalar_select %p2323_p13, 1, 0 }
  0x4b   : > { %2798 = sst [smem:[#allocation24_spill]] %s2332_s6  ;;  %p2799_p9 = scmp.eq.s32.totalorder %s2096_s18, 0 }
  0x4c   : > { %p2342_p8 = por %p193_p4, %p2766_p6  ;;  %p244_p10 = scmp.ne.s32.totalorder %s2052_s29, %s2048_s28 }
  0x4d   : > { %p2336_p7 = por %p187_p11, %p2799_p9  ;;  %p245_p12 = scmp.eq.s32.totalorder %s2312_s7, 3 }
  0x4e   : > { %s2801_s11 = scalar_select %p2342_p8, 1, 0 }
  0x4f   : > { %p250_p0 = scmp.ne.s32.totalorder %s2048_s28, %s2044_s27  ;;  %p251_p5 = scmp.eq.s32.totalorder %s1413_s14, 3 }
  0x50   : > { %p2351_p1 = por %p245_p12, %p244_p10  ;;  %p1414_p3 = scmp.ge.s32.totalorder %s2096_s18, 1 }
  0x51   : > { %p2356_p2 = por %p251_p5, %p250_p0  ;;  %p258_p11 = scmp.lt.s32.totalorder %s2096_s18, 5 }
  0x52   : > { %s2802_s30 = scalar_select %p2351_p1, 1, 0 }
  0x53   : > { %s2803_s23 = scalar_select %p2356_p2, 1, 0 }
  0x54   : > { %p2361_p4 = pnand %p1414_p3, %p258_p11  ;;  %s2101_s22 = smov [#allocation6]  }
  0x55   : > { %s276_s24 = sshll.u32 %s2101_s22, 4  ;;  %p2805_p10 = scmp.lt.s32.totalorder %s2096_s18, 4  ;;  %s2365_s24 = int_to_ptr.vmem [resolvable:$true] %s276_s24 }
  0x56   : > { %s2804_s21 = scalar_select %p2361_p4, 1, 0 }
  0x57   : > { %p1636_p9 = pneg %p2361_p4  ;;  %p2373_p12 = pnand %p2805_p10, %p2336_p7 }
  0x58   : > { %s324_s26 = sand.u32 1, %s2064_s10   ;;  %s1489_s1 = sshll.u32 %s2088_s16, 7 }
  0x59   : > { %s2806_s25 = scalar_select %p2373_p12, 1, 0 }
  0x5a   : > { %p2380_p0 = pnand %p1636_p9, %p2766_p6  ;;  %s1420_s20 = sshll.u32 %s324_s26, 7 }
  0x5b   : > { %s2808_s4 = sld [smem:[#allocation29_spill]] }
  0x5c   : > { %p1886_p5 = pneg %p2380_p0 }
  0x61   : > { %s1884_s0 = scalar_lea.hbm %s2808_s4, 1024 }
  0x62   : > { %p1885_p7 = scmp.ne.s32.totalorder %s2808_s4, %s1884_s0  ;;  %p1891_p9 = scmp.lt.u32.totalorder %s1884_s0, %s2808_s4 }
  0x64   : > { %p1887_p3 = pnand %p1886_p5, %p1885_p7 }
  0x66   : > { %p1888_p11 = pneg %p1887_p3 }
  0x68   : > { %p1893_p10 = pnand %p1891_p9, %p1888_p11 }
  0x6a   : > { %1896 = shalt.err (!%p1893_p10)
}
  0x6b   : > { %s1897_s26 = scalar_lea.vmem %s2365_s24, 1024  ;;  %p1905_p8 = scmp.lt.s32.totalorder %s2365_s24, %s2365_s24 }
  0x6c   : > { %p1898_p6 = scmp.ne.s32.totalorder %s2365_s24, %s1897_s26  ;;  %p1906_p13 = scmp.lt.s32.totalorder %s1897_s26, %s1897_s26 }
  0x6e   : > { %p1900_p2 = pnand %p1898_p6, %p1886_p5  ;;  %p1907_p4 = por %p1906_p13, %p1905_p8 }
  0x70   : > { %p1901_p1 = pneg %p1900_p2 }
  0x72   : > { %p1908_p12 = pnand %p1907_p4, %p1901_p1 }
  0x74   : > { %1911 = shalt.err (!%p1908_p12)
}
  0x75   : > { %s2102_s17 = smov 64   ;;  %s2103_s0 = smov 4  }
  0x76   : > { %1639 = dma.hbm_to_vmem [thread:$0]  (!%p2380_p0), %s2808_s4, 1024, %s2365_s24, [#allocation7], %s2102_s17, %s2102_s17, %s2103_s0  }
  0x77   : > { %s2809_s15 = sld [smem:[#allocation31_spill]]  ;;  %s326_s26 = scalar_lea.vmem [#allocation8], %s1420_s20 }
  0x78   : > { %s333_s10 = sshll.u32 %s326_s26, 4  ;;  %p2811_p13 = scmp.ne.s32.totalorder %s2806_s25, 0  ;;  %s2411_s10 = int_to_ptr.vmem [resolvable:$true] %s333_s10 }
  0x7a   : > { %p1914_p8 = pneg %p2811_p13 }
  0x7d   : > { %s2810_s6 = smov %s2809_s15  ;;  %s2409_s16 = scalar_lea.hbm %s2809_s15, %s1489_s1 }
  0x7e   : > { %s1912_s19 = scalar_lea.hbm %s2409_s16, 2048  ;;  %s1917_s1 = scalar_lea.hbm %s2810_s6, 4096 }
  0x7f   : > { %p1913_p6 = scmp.ne.s32.totalorder %s2409_s16, %s1912_s19  ;;  %p1918_p4 = scmp.lt.u32.totalorder %s2409_s16, %s2810_s6 }
  0x80   : > { %p1919_p12 = scmp.lt.u32.totalorder %s1917_s1, %s1912_s19  ;;  %p1921_p7 = scmp.lt.u32.totalorder %s1912_s19, %s2409_s16 }
  0x81   : > { %p1915_p1 = pnand %p1914_p8, %p1913_p6 }
  0x82   : > { %p1920_p0 = por %p1919_p12, %p1918_p4 }
  0x83   : > { %p1916_p2 = pneg %p1915_p1 }
  0x84   : > { %p1922_p5 = por %p1921_p7, %p1920_p0 }
  0x86   : > { %p1923_p3 = pnand %p1922_p5, %p1916_p2 }
  0x88   : > { %1926 = shalt.err (!%p1923_p3)
}
  0x89   : > { %s1927_s20 = scalar_lea.vmem %s2411_s10, 2048  ;;  %s2104_s5 = smov [#allocation8]  }
  0x8a   : > { %p1928_p11 = scmp.ne.s32.totalorder %s2411_s10, %s1927_s20  ;;  %s1932_s13 = sshll.u32 %s2104_s5, 4  ;;  %s1933_s13 = int_to_ptr.vmem [resolvable:$false] %s1932_s13 }
  0x8b   : > { %s1934_s2 = scalar_lea.vmem %s1933_s13, 4096  ;;  %p1935_p6 = scmp.lt.s32.totalorder %s2411_s10, %s1933_s13 }
  0x8c   : > { %p1930_p9 = pnand %p1928_p11, %p1914_p8  ;;  %p1936_p1 = scmp.lt.s32.totalorder %s1934_s2, %s1927_s20 }
  0x8e   : > { %p1931_p10 = pneg %p1930_p9  ;;  %p1937_p4 = por %p1936_p1, %p1935_p6 }
  0x90   : > { %p1938_p12 = pnand %p1937_p4, %p1931_p10 }
  0x92   : > { %1941 = shalt.err (!%p1938_p12)
}
  0x93   : > { %s2105_s19 = smov 256   ;;  %s2812_s22 = smov 8  }
  0x94   : > { %s2813_s15 = smov 128   ;;  %p2814_p8 = scmp.ne.s32.totalorder %s2804_s21, 0 }
  0x95   : > { %1646 = dma.hbm_to_vmem [thread:$0]  (!%p2811_p13), %s2409_s16, 2048, %s2411_s10, %s2280_s3, %s2105_s19, %s2813_s15, %s2812_s22  }
  0x96   : > { %353 = sbr.rel (%p2814_p8) target bundleno = 1725 (0x6bd), region = 52  ;;  %s355_s26 = sand.u32 (!%p2814_p8), 1, %s2312_s7  }
  0x97   : > { %s357_s24 = sand.u32 (!%p2814_p8), 1, %s2072_s12   ;;  %s356_s1 = scalar_lea.sflag (!%p2814_p8), [#allocation4], %s355_s26 }
  0x98   : > { %s1424_s14 = sshll.u32 (!%p2814_p8), %s357_s24, 7  ;;  %p2815_p2 = scmp.ne.s32.totalorder (!%p2814_p8), %s2797_s8, 0 }
  0x99   : > { %s2445_s17 = scalar_lea.vmem (!%p2814_p8), [#allocation3], %s1424_s14 }
  0x9d   : > { %2027 = dma.done.wait (%p2815_p2), %s356_s1, 2048  }
  0x9e   : > { %2029 = vsyncadd (%p2815_p2), %s356_s1, 4294965248  ;;  %p2816_p0 = scmp.eq.s32.totalorder %s2312_s7, 0 }
  0xa0   : > { %2031 = dma.done.wait (%p2816_p0), [#allocation7], 1024   ;;  %p2817_p13 = pmov %p2816_p0 }
  0xa1   : > { %s370_s10 = sand.u32 1, %s2060_s9   ;;  %p2818_p7 = scmp.ne.s32.totalorder %s2801_s11, 0 }
  0xa2   : > { %2033 = vsyncadd (%p2817_p13), [#allocation7], 4294966272  ;;  %s1426_s16 = sshll.u32 %s370_s10, 7 }
  0xa3   : > { %s2456_s3 = scalar_lea.vmem [#allocation8], %s1426_s16 }
  0xa4   : > { %2035 = dma.done.wait (%p2818_p7), %s356_s1, 2048  }
  0xa5   : > { %2037 = vsyncadd (%p2818_p7), %s356_s1, 4294965248  ;;  %s2819_s8 = sld [smem:[#allocation17_spill]]  ;;  %s2820_s21 = sld [smem:[#allocation16_spill]] }
  0xa6   : > { %s2774_s25 = sand.u32 1, %s2048_s28   ;;  %s2821_s2 = sld [smem:[#allocation26_spill]] }
  0xa7   : > { %s1427_s7 = sshll.u32 %s2774_s25, 5  ;;  %s2822_s26 = sld [smem:[#allocation32_spill]] }
  0xa8   : > { %s2483_s14 = scalar_lea.vmem [#allocation9], %s1427_s7 }
  0xab   : > { %p419_p5 = scmp.lt.s32.totalorder %s2819_s8, 1  ;;  %s2467_s0 = sshll.u32 %s2820_s21, 1 }
  0xac   : > { %p426_p3 = scmp.lt.s32.totalorder %s2467_s0, 3  ;;  %p1431_p11 = scmp.ne.s32.totalorder %s2820_s21, 0 }
  0xad   : > { %s2858_s8 = smov (!%p419_p5, %s2819_s8), 1  ;;  %s2823_s16 = sld [smem:[#allocation27_spill]] (!%p1431_p11)  ;;  %v436_v4 = vld [vmem:[%s2445_s17] sm:$0xff] (!%p1431_p11)  ;;  %v437_v5 = vld [vmem:[%s2445_s17 + $0x8] sm:$0xff] (!%p1431_p11)  ;;  %v438_v11 = vld [vmem:[%s2445_s17 + $0x10] sm:$0xff] (!%p1431_p11)  ;;  %v2106_v48 = vmov (!%p1431_p11), 0  }
  0xae   : > { %s2472_s20 = scalar_select %p426_p3, %s2467_s0, 3 }
  0xaf   : > { %s1490_s11 = sshll.u32 %s2858_s8, 3  ;;  %435 = sbr.rel (%p1431_p11) target bundleno = 1459 (0x5b3), region = 68  ;;  %v452_v6 = vpack.c.bf16 (!%p1431_p11), %v437_v5, %v436_v4  ;;  %v439_v12 = vld [vmem:[%s2445_s17 + $0x18] sm:$0xff] (!%p1431_p11)  ;;  %v440_v13 = vld [vmem:[%s2445_s17 + $0x20] sm:$0xff] (!%p1431_p11)  ;;  %v441_v14 = vld [vmem:[%s2445_s17 + $0x28] sm:$0xff] (!%p1431_p11)  ;;  %v2107_v50 = vmov (!%p1431_p11), 0.0  }
  0xb0   : > { %s2477_s19 = scalar_lea.vmem %s2821_s2, %s1490_s11  ;;  %s428_s24 = scalar_lea.vmem %s2822_s26, %s2472_s20  ;;  %v453_v16 = vpack.c.bf16 (!%p1431_p11), %v439_v12, %v438_v11  ;;  %v454_v17 = vpack.c.bf16 (!%p1431_p11), %v441_v14, %v440_v13  ;;  %v442_v20 = vld [vmem:[%s2445_s17 + $0x30] sm:$0xff] (!%p1431_p11)  ;;  %v443_v21 = vld [vmem:[%s2445_s17 + $0x38] sm:$0xff] (!%p1431_p11)  ;;  %v444_v23 = vld [vmem:[%s2445_s17 + $0x40] sm:$0xff] (!%p1431_p11)  ;;  %1566 = vmatprep.subr.bf16.mxu1 (!%p1431_p11), %v2107_v50  ;;  %vm2108_vm0 = vmmov (!%p1431_p11), 0  }
  0xb1   : > { %1550 = vmatprep.mubr.bf16.mxu0 (!%p1431_p11), %v452_v6  ;;  %s2825_s11 = sld [smem:[#allocation30_spill]] (!%p1431_p11)  ;;  %v445_v24 = vld [vmem:[%s2445_s17 + $0x48] sm:$0xff] (!%p1431_p11)  ;;  %v455_v26 = vpack.c.bf16 (!%p1431_p11), %v443_v21, %v442_v20  ;;  %v446_v30 = vld [vmem:[%s2445_s17 + $0x50] sm:$0xff] (!%p1431_p11)  ;;  %v447_v31 = vld [vmem:[%s2445_s17 + $0x58] sm:$0xff] (!%p1431_p11)  ;;  %1582 = vmatprep.mubr.msk.bf16.mxu1 (!%p1431_p11), %vm2108_vm0, %v2107_v50  ;;  %s2827_s22 = sld [smem:[#allocation28_spill]] (!%p1431_p11) }
  0xb2   : > { %v456_v27 = vpack.c.bf16 (!%p1431_p11), %v445_v24, %v444_v23  ;;  %v448_v33 = vld [vmem:[%s2445_s17 + $0x60] sm:$0xff] (!%p1431_p11)  ;;  %v449_v34 = vld [vmem:[%s2445_s17 + $0x68] sm:$0xff] (!%p1431_p11)  ;;  %v457_v36 = vpack.c.bf16 (!%p1431_p11), %v447_v31, %v446_v30  ;;  %v450_v40 = vld [vmem:[%s2445_s17 + $0x70] sm:$0xff] (!%p1431_p11) }
  0xb3   : > { %s2824_s25 = smov (!%p1431_p11), %s2823_s16  ;;  %v1780_v0 = vld [vmem:[%s2823_s16] sm:$0xff] (!%p1431_p11)   ;;  %v458_v37 = vpack.c.bf16 (!%p1431_p11), %v449_v34, %v448_v33  ;;  %v451_v41 = vld [vmem:[%s2445_s17 + $0x78] sm:$0xff] (!%p1431_p11)  ;;  %v1812_v49 = vld [vmem:[#allocation6] sm:$0xff] (!%p1431_p11)  }
  0xb4   : > { %v1781_v1 = vld [vmem:[%s2824_s25 + $0x8] sm:$0xff] (!%p1431_p11)   ;;  %1534 = vmatprep.subr.bf16.mxu0 (!%p1431_p11), %v1780_v0  ;;  %v1782_v2 = vld [vmem:[%s2824_s25 + $0x10] sm:$0xff] (!%p1431_p11)   ;;  %v1783_v3 = vld [vmem:[%s2824_s25 + $0x18] sm:$0xff] (!%p1431_p11)   ;;  %v459_v43 = vpack.c.bf16 (!%p1431_p11), %v451_v41, %v450_v40  ;;  %1567 = vmatpush3.bf16.msra.mxu1 (!%p1431_p11), %v1812_v49 }
  0xb5   : > { %1535 = vmatpush3.bf16.msra.mxu0 (!%p1431_p11), %v1780_v0  ;;  %v1784_v7 = vld [vmem:[%s2824_s25 + $0x20] sm:$0xff] (!%p1431_p11)   ;;  %v1785_v8 = vld [vmem:[%s2824_s25 + $0x28] sm:$0xff] (!%p1431_p11)   ;;  %v1786_v9 = vld [vmem:[%s2824_s25 + $0x30] sm:$0xff] (!%p1431_p11)   ;;  %1568 = vmatprep.subr.bf16.mxu1 (!%p1431_p11), %v2107_v50 }
  0xb6   : > { %1536 = vmatprep.subr.bf16.mxu0 %v1781_v1  ;;  %v1787_v10 = vld [vmem:[%s2824_s25 + $0x38] sm:$0xff]   ;;  %v1814_v52 = vld [vmem:[#allocation6 + $0x10] sm:$0xff]   ;;  %v1815_v53 = vld [vmem:[#allocation6 + $0x18] sm:$0xff]  }
  0xb7   : > { %s2826_s5 = smov %s2825_s11  ;;  %v1790_v15 = vld [vmem:[%s2825_s11 + $0x4] ss:$8 sps:$4 sm:$0xff]   ;;  %v1813_v51 = vld [vmem:[#allocation6 + $0x8] sm:$0xff]   ;;  %v1816_v54 = vld [vmem:[#allocation6 + $0x20] sm:$0xff]  }
  0xb8   : > { %v1788_v18 = vld [vmem:[%s2826_s5] ss:$8 sps:$4 sm:$0xff]   ;;  %v1793_v19 = vld [vmem:[%s2826_s5 + $0x14] ss:$8 sps:$4 sm:$0xff]   ;;  %v1791_v22 = vld [vmem:[%s2826_s5 + $0x10] ss:$8 sps:$4 sm:$0xff]   ;;  %1569 = vmatpush3.bf16.msra.mxu1 %v1813_v51 }
  0xb9   : > { %1537 = vmatpush3.bf16.msra.mxu0 %v1781_v1  ;;  %v1796_v25 = vld [vmem:[%s2826_s5 + $0x24] ss:$8 sps:$4 sm:$0xff]   ;;  %v1794_v28 = vld [vmem:[%s2826_s5 + $0x20] ss:$8 sps:$4 sm:$0xff]   ;;  %v1799_v29 = vld [vmem:[%s2826_s5 + $0x34] ss:$8 sps:$4 sm:$0xff]   ;;  %1570 = vmatprep.subr.bf16.mxu1 %v2107_v50 }
  0xba   : > { %1538 = vmatprep.subr.bf16.mxu0 %v1782_v2  ;;  %v1797_v32 = vld [vmem:[%s2826_s5 + $0x30] ss:$8 sps:$4 sm:$0xff]   ;;  %v1802_v35 = vld [vmem:[%s2826_s5 + $0x44] ss:$8 sps:$4 sm:$0xff]   ;;  %v1800_v38 = vld [vmem:[%s2826_s5 + $0x40] ss:$8 sps:$4 sm:$0xff]  }
  0xbb   : > { %v1805_v39 = vld [vmem:[%s2826_s5 + $0x54] ss:$8 sps:$4 sm:$0xff]   ;;  %v1803_v42 = vld [vmem:[%s2826_s5 + $0x50] ss:$8 sps:$4 sm:$0xff]   ;;  %v1808_v44 = vld [vmem:[%s2826_s5 + $0x64] ss:$8 sps:$4 sm:$0xff]  }
  0xbc   : > { %v1806_v45 = vld [vmem:[%s2826_s5 + $0x60] ss:$8 sps:$4 sm:$0xff]   ;;  %v1811_v46 = vld [vmem:[%s2826_s5 + $0x74] ss:$8 sps:$4 sm:$0xff]   ;;  %v1809_v47 = vld [vmem:[%s2826_s5 + $0x70] ss:$8 sps:$4 sm:$0xff]   ;;  %1571 = vmatpush3.bf16.msra.mxu1 %v1814_v52 }
  0xbd   : > { %1539 = vmatpush3.bf16.msra.mxu0 %v1782_v2  ;;  %1572 = vmatprep.subr.bf16.mxu1 %v2107_v50  ;;  %v1817_v55 = vld [vmem:[#allocation6 + $0x28] sm:$0xff]   ;;  %v1818_v56 = vld [vmem:[#allocation6 + $0x30] sm:$0xff]   ;;  %v1819_v57 = vld [vmem:[#allocation6 + $0x38] sm:$0xff]  }
  0xbe   : > { %1540 = vmatprep.subr.bf16.mxu0 %v1783_v3  ;;  %v2585_v58 = vld [vmem:[%s2477_s19] sm:$0xff]  }
  0xbf   : > { %v1432_v59 = vld [vmem:[%s2827_s22] ss:$0 sm:$0xff] }
  0xc0   : > { %1573 = vmatpush3.bf16.msra.mxu1 %v1815_v53 }
  0xc1   : > { %1541 = vmatpush3.bf16.msra.mxu0 %v1783_v3  ;;  %1574 = vmatprep.subr.bf16.mxu1 %v2107_v50 }
  0xc2   : > { %1542 = vmatprep.subr.bf16.mxu0 %v1784_v7 }
  0xc4   : > { %1575 = vmatpush3.bf16.msra.mxu1 %v1816_v54 }
  0xc5   : > { %1543 = vmatpush3.bf16.msra.mxu0 %v1784_v7  ;;  %1576 = vmatprep.subr.bf16.mxu1 %v2107_v50 }
  0xc6   : > { %1544 = vmatprep.subr.bf16.mxu0 %v1785_v8 }
  0xc8   : > { %1577 = vmatpush3.bf16.msra.mxu1 %v1817_v55 }
  0xc9   : > { %1545 = vmatpush3.bf16.msra.mxu0 %v1785_v8  ;;  %1578 = vmatprep.subr.bf16.mxu1 %v2107_v50 }
  0xca   : > { %1546 = vmatprep.subr.bf16.mxu0 %v1786_v9 }
  0xcc   : > { %1579 = vmatpush3.bf16.msra.mxu1 %v1818_v56 }
  0xcd   : > { %1547 = vmatpush3.bf16.msra.mxu0 %v1786_v9  ;;  %1580 = vmatprep.subr.bf16.mxu1 %v2107_v50 }
  0xce   : > { %1548 = vmatprep.subr.bf16.mxu0 %v1787_v10 }
  0xd0   : > { %1581 = vmatpush3.bf16.msra.mxu1 %v1819_v57 }
  0xd1   : > { %1549 = vmatpush3.bf16.msra.mxu0 %v1787_v10  ;;  %1586 = vmatprep.subr.bf16.mxu1 %v2107_v50 }
  0xd2   : > { %863 = vmatprep.subr.bf16.mxu0 %v1790_v15 }
  0xd3   : > { %1583 = vmatmul.mubr.bf16.vlgmr.msra.gmra.mrb[0].mxu1 %v2585_v58 }
  0xd4   : > { %1551 = vmatmul.mubr.bf16.vlgmr.msra.gmra.mrb[0].mxu0 %v453_v16  ;;  %1602 = vmatprep.mubr.msk.bf16.mxu1 %vm2108_vm0, %v2107_v50 }
  0xd5   : > { %1554 = vmatprep.mubr.bf16.mxu0 %v454_v17  ;;  %864 = vmatpush1.bf16.msra.mxu0 %v1788_v18 }
  0xd6   : > { %865 = vmatprep.subr.bf16.mxu0 %v1793_v19 }
  0xd9   : > { %866 = vmatpush1.bf16.msra.mxu0 %v1791_v22 }
  0xda   : > { %867 = vmatprep.subr.bf16.mxu0 %v1796_v25 }
  0xdc   : > { %1555 = vmatmul.mubr.bf16.gmra.mrb[4].mxu0 %v455_v26 }
  0xdd   : > { %1558 = vmatprep.mubr.bf16.mxu0 %v456_v27  ;;  %868 = vmatpush1.bf16.msra.mxu0 %v1794_v28 }
  0xde   : > { %869 = vmatprep.subr.bf16.mxu0 %v1799_v29 }
  0xe1   : > { %870 = vmatpush1.bf16.msra.mxu0 %v1797_v32 }
  0xe2   : > { %871 = vmatprep.subr.bf16.mxu0 %v1802_v35 }
  0xe4   : > { %1559 = vmatmul.mubr.bf16.gmra.mrb[8].mxu0 %v457_v36 }
  0xe5   : > { %1562 = vmatprep.mubr.bf16.mxu0 %v458_v37  ;;  %872 = vmatpush1.bf16.msra.mxu0 %v1800_v38 }
  0xe6   : > { %873 = vmatprep.subr.bf16.mxu0 %v1805_v39 }
  0xe9   : > { %874 = vmatpush1.bf16.msra.mxu0 %v1803_v42 }
  0xea   : > { %875 = vmatprep.subr.bf16.mxu0 %v1808_v44 }
  0xec   : > { %1563 = vmatmul.mubr.bf16.gmra.mrb[12].mxu0 %v459_v43 }
  0xed   : > { %876 = vmatpush1.bf16.msra.mxu0 %v1806_v45  ;;  %895 = vmatprep.mubr.bf16.mxu0 %v2106_v48 }
  0xee   : > { %877 = vmatprep.subr.bf16.mxu0 %v1811_v46 }
  0xf1   : > { %878 = vmatpush1.bf16.msra.mxu0 %v1809_v47 }
  0xf2   : > { %1606 = vmatprep.subr.bf16.mxu0 %v2107_v50 }
 0x1a6   : > { %v750_v54 = vpop.f32.mrb[0].mxu1 }
 0x1a7   : > { %v1552_v60 = vpop.f32.mrb[0].mxu0  ;;  %v2605_v55 = vmul.f32 0.088388346, %v750_v54  ;;  %v1584_v56 = vpop.f32.mrb[1].mxu1 }
 0x1a8   : > { %v574_v61 = vadd.f32 %v1552_v60, %v1432_v59  ;;  %v565_v62 = vpop.f32.mrb[1].mxu0  ;;  %v753_v57 = vpop.f32.mrb[2].mxu1 }
 0x1a9   : > { %v566_v63 = vadd.f32 %v1432_v59, %v565_v62  ;;  %v1553_v0 = vpop.f32.mrb[2].mxu0  ;;  %v1585_v60 = vpop.f32.mrb[3].mxu1 }
 0x1aa   : > { %v577_v1 = vadd.f32 %v1553_v0, %v1432_v59  ;;  %v568_v2 = vpop.f32.mrb[3].mxu0  ;;  %v630_v4 = vmax.f32 %v574_v61, 0.0 }
 0x1ab   : > { %v569_v3 = vadd.f32 %v1432_v59, %v568_v2  ;;  %v628_v6 = vmax.f32 %v566_v63, 0.0 }
 0x1ac   : > { %v631_v5 = vmax.f32 %v577_v1, 0.0 }
 0x1ad   : > { %v629_v7 = vmax.f32 %v569_v3, 0.0 }
 0x1ae   : > { %v760_v8 = vpack.c.bf16 %v631_v5, %v630_v4 }
 0x1af   : > { %v759_v9 = vpack.c.bf16 %v629_v7, %v628_v6  ;;  %v1556_v10 = vpop.f32.mrb[4].mxu0 }
 0x1b0   : > { %v590_v11 = vadd.f32 %v1556_v10, %v1432_v59  ;;  %v581_v12 = vpop.f32.mrb[5].mxu0 }
 0x1b1   : > { %896 = vmatmul.mubr.bf16.vlgmr.msra.gmra.mrb[16].mxu0 %v759_v9  ;;  %v582_v13 = vadd.f32 %v1432_v59, %v581_v12  ;;  %v1557_v14 = vpop.f32.mrb[6].mxu0 }
 0x1b2   : > { %v634_v15 = vmax.f32 %v590_v11, 0.0  ;;  %v593_v16 = vadd.f32 %v1557_v14, %v1432_v59  ;;  %v584_v17 = vpop.f32.mrb[7].mxu0  ;;  %905 = vmatprep.mubr.bf16.mxu0 %v2106_v48 }
 0x1b3   : > { %v632_v18 = vmax.f32 %v582_v13, 0.0  ;;  %v585_v19 = vadd.f32 %v1432_v59, %v584_v17 }
 0x1b4   : > { %v635_v20 = vmax.f32 %v593_v16, 0.0 }
 0x1b5   : > { %v633_v21 = vmax.f32 %v585_v19, 0.0 }
 0x1b6   : > { %v762_v22 = vpack.c.bf16 %v635_v20, %v634_v15 }
 0x1b7   : > { %v761_v23 = vpack.c.bf16 %v633_v21, %v632_v18  ;;  %v1560_v24 = vpop.f32.mrb[8].mxu0 }
 0x1b8   : > { %v606_v25 = vadd.f32 %v1560_v24, %v1432_v59  ;;  %v597_v26 = vpop.f32.mrb[9].mxu0 }
 0x1b9   : > { %906 = vmatmul.mubr.bf16.gmra.mrb[20].mxu0 %v760_v8  ;;  %v598_v27 = vadd.f32 %v1432_v59, %v597_v26  ;;  %v1561_v28 = vpop.f32.mrb[10].mxu0 }
 0x1ba   : > { %915 = vmatprep.mubr.bf16.mxu0 %v2106_v48  ;;  %v638_v29 = vmax.f32 %v606_v25, 0.0  ;;  %v609_v30 = vadd.f32 %v1561_v28, %v1432_v59  ;;  %v600_v31 = vpop.f32.mrb[11].mxu0 }
 0x1bb   : > { %v636_v32 = vmax.f32 %v598_v27, 0.0  ;;  %v601_v33 = vadd.f32 %v1432_v59, %v600_v31 }
 0x1bc   : > { %v639_v34 = vmax.f32 %v609_v30, 0.0 }
 0x1bd   : > { %v637_v35 = vmax.f32 %v601_v33, 0.0 }
 0x1be   : > { %v764_v36 = vpack.c.bf16 %v639_v34, %v638_v29 }
 0x1bf   : > { %v763_v37 = vpack.c.bf16 %v637_v35, %v636_v32  ;;  %v1564_v38 = vpop.f32.mrb[12].mxu0 }
 0x1c0   : > { %v622_v39 = vadd.f32 %v1564_v38, %v1432_v59  ;;  %v613_v40 = vpop.f32.mrb[13].mxu0 }
 0x1c1   : > { %916 = vmatmul.mubr.bf16.gmra.mrb[24].mxu0 %v761_v23  ;;  %v614_v41 = vadd.f32 %v1432_v59, %v613_v40  ;;  %v1565_v42 = vpop.f32.mrb[14].mxu0 }
 0x1c2   : > { %925 = vmatprep.mubr.bf16.mxu0 %v2106_v48  ;;  %v642_v43 = vmax.f32 %v622_v39, 0.0  ;;  %v625_v44 = vadd.f32 %v1565_v42, %v1432_v59  ;;  %v616_v45 = vpop.f32.mrb[15].mxu0 }
 0x1c3   : > { %v640_v46 = vmax.f32 %v614_v41, 0.0  ;;  %v617_v47 = vadd.f32 %v1432_v59, %v616_v45  ;;  %v2607_v59 = vmul.f32 0.088388346, %v753_v57 }
 0x1c4   : > { %v643_v49 = vmax.f32 %v625_v44, 0.0 }
 0x1c5   : > { %v641_v51 = vmax.f32 %v617_v47, 0.0  ;;  %v976_v61 = vpack.c.bf16 %v2607_v59, %v2605_v55 }
 0x1c6   : > { %v766_v52 = vpack.c.bf16 %v643_v49, %v642_v43 }
 0x1c7   : > { %v765_v53 = vpack.c.bf16 %v641_v51, %v640_v46 }
 0x1c9   : > { %926 = vmatmul.mubr.bf16.gmra.mrb[28].mxu0 %v762_v22 }
 0x1ca   : > { %935 = vmatprep.mubr.bf16.mxu0 %v2106_v48 }
 0x1d1   : > { %936 = vmatmul.mubr.bf16.gmra.mrb[32].mxu0 %v763_v37 }
 0x1d2   : > { %945 = vmatprep.mubr.bf16.mxu0 %v2106_v48 }
 0x1d9   : > { %946 = vmatmul.mubr.bf16.gmra.mrb[36].mxu0 %v764_v36 }
 0x1da   : > { %955 = vmatprep.mubr.bf16.mxu0 %v2106_v48 }
 0x1e1   : > { %956 = vmatmul.mubr.bf16.gmra.mrb[40].mxu0 %v765_v53 }
 0x1e2   : > { %965 = vmatprep.mubr.bf16.mxu0 %v2106_v48 }
 0x1e9   : > { %966 = vmatmul.mubr.bf16.gmra.mrb[44].mxu0 %v766_v52 }
 0x1ea   : > { %1622 = vmatprep.mubr.msk.bf16.mxu0 %vm2108_vm0, %v2107_v50 }
 0x284   : > { %v897_v62 = vpop.f32.mrb[16].mxu0 }
 0x285   : > { %v899_v63 = vpop.f32.mrb[17].mxu0 }
 0x286   : > { %v901_v0 = vpop.f32.mrb[18].mxu0 }
 0x287   : > { %v977_v1 = vpack.c.bf16 %v901_v0, %v897_v62  ;;  %v903_v48 = vpop.f32.mrb[19].mxu0 }
 0x288   : > { %v1045_v2 = vpack.c.bf16 %v903_v48, %v899_v63  ;;  %v1094_v48 = vunpack.c.l.bf16 %v2585_v58 }
 0x289   : > { %1587 = vmatpush3.bf16.xpose.msra.mxu1 %v977_v1 }
 0x28a   : > { %1607 = vmatpush3.bf16.msra.mxu0 %v1045_v2  ;;  %1588 = vmatprep.subr.bf16.mxu1 %v2107_v50  ;;  %v1095_v2 = vunpack.c.h.bf16 %v2585_v58 }
 0x28b   : > { %1608 = vmatprep.subr.bf16.mxu0 %v2107_v50 }
 0x28c   : > { %v907_v3 = vpop.f32.mrb[20].mxu0 }
 0x28d   : > { %v909_v4 = vpop.f32.mrb[21].mxu0 }
 0x28e   : > { %v911_v5 = vpop.f32.mrb[22].mxu0 }
 0x28f   : > { %v978_v6 = vpack.c.bf16 %v911_v5, %v907_v3  ;;  %v913_v7 = vpop.f32.mrb[23].mxu0 }
 0x290   : > { %v1046_v8 = vpack.c.bf16 %v913_v7, %v909_v4 }
 0x291   : > { %1589 = vmatpush3.bf16.xpose.msra.mxu1 %v978_v6 }
 0x292   : > { %1609 = vmatpush3.bf16.msra.mxu0 %v1046_v8  ;;  %1590 = vmatprep.subr.bf16.mxu1 %v2107_v50 }
 0x293   : > { %1610 = vmatprep.subr.bf16.mxu0 %v2107_v50 }
 0x294   : > { %v917_v9 = vpop.f32.mrb[24].mxu0 }
 0x295   : > { %v919_v10 = vpop.f32.mrb[25].mxu0 }
 0x296   : > { %v921_v11 = vpop.f32.mrb[26].mxu0 }
 0x297   : > { %v979_v12 = vpack.c.bf16 %v921_v11, %v917_v9  ;;  %v923_v13 = vpop.f32.mrb[27].mxu0 }
 0x298   : > { %v1047_v14 = vpack.c.bf16 %v923_v13, %v919_v10 }
 0x299   : > { %1591 = vmatpush3.bf16.xpose.msra.mxu1 %v979_v12 }
 0x29a   : > { %1611 = vmatpush3.bf16.msra.mxu0 %v1047_v14  ;;  %1592 = vmatprep.subr.bf16.mxu1 %v2107_v50 }
 0x29b   : > { %1612 = vmatprep.subr.bf16.mxu0 %v2107_v50 }
 0x29c   : > { %v927_v15 = vpop.f32.mrb[28].mxu0 }
 0x29d   : > { %v929_v16 = vpop.f32.mrb[29].mxu0 }
 0x29e   : > { %v931_v17 = vpop.f32.mrb[30].mxu0 }
 0x29f   : > { %v980_v18 = vpack.c.bf16 %v931_v17, %v927_v15  ;;  %v933_v19 = vpop.f32.mrb[31].mxu0 }
 0x2a0   : > { %v1048_v20 = vpack.c.bf16 %v933_v19, %v929_v16 }
 0x2a1   : > { %1593 = vmatpush3.bf16.xpose.msra.mxu1 %v980_v18 }
 0x2a2   : > { %1613 = vmatpush3.bf16.msra.mxu0 %v1048_v20  ;;  %1594 = vmatprep.subr.bf16.mxu1 %v2107_v50 }
 0x2a3   : > { %1614 = vmatprep.subr.bf16.mxu0 %v2107_v50 }
 0x2a4   : > { %v937_v21 = vpop.f32.mrb[32].mxu0 }
 0x2a5   : > { %v939_v22 = vpop.f32.mrb[33].mxu0 }
 0x2a6   : > { %v941_v23 = vpop.f32.mrb[34].mxu0 }
 0x2a7   : > { %v981_v24 = vpack.c.bf16 %v941_v23, %v937_v21  ;;  %v943_v25 = vpop.f32.mrb[35].mxu0 }
 0x2a8   : > { %v1049_v26 = vpack.c.bf16 %v943_v25, %v939_v22 }
 0x2a9   : > { %1595 = vmatpush3.bf16.xpose.msra.mxu1 %v981_v24 }
 0x2aa   : > { %1615 = vmatpush3.bf16.msra.mxu0 %v1049_v26  ;;  %1596 = vmatprep.subr.bf16.mxu1 %v2107_v50 }
 0x2ab   : > { %1616 = vmatprep.subr.bf16.mxu0 %v2107_v50 }
 0x2ac   : > { %v947_v27 = vpop.f32.mrb[36].mxu0 }
 0x2ad   : > { %v949_v28 = vpop.f32.mrb[37].mxu0 }
 0x2ae   : > { %v951_v29 = vpop.f32.mrb[38].mxu0 }
 0x2af   : > { %v982_v30 = vpack.c.bf16 %v951_v29, %v947_v27  ;;  %v953_v31 = vpop.f32.mrb[39].mxu0 }
 0x2b0   : > { %v1050_v32 = vpack.c.bf16 %v953_v31, %v949_v28 }
 0x2b1   : > { %1597 = vmatpush3.bf16.xpose.msra.mxu1 %v982_v30 }
 0x2b2   : > { %1617 = vmatpush3.bf16.msra.mxu0 %v1050_v32  ;;  %1598 = vmatprep.subr.bf16.mxu1 %v2107_v50 }
 0x2b3   : > { %1618 = vmatprep.subr.bf16.mxu0 %v2107_v50 }
 0x2b4   : > { %v957_v33 = vpop.f32.mrb[40].mxu0 }
 0x2b5   : > { %v959_v34 = vpop.f32.mrb[41].mxu0 }
 0x2b6   : > { %v961_v35 = vpop.f32.mrb[42].mxu0 }
 0x2b7   : > { %v983_v36 = vpack.c.bf16 %v961_v35, %v957_v33  ;;  %v963_v37 = vpop.f32.mrb[43].mxu0 }
 0x2b8   : > { %v1051_v38 = vpack.c.bf16 %v963_v37, %v959_v34 }
 0x2b9   : > { %1599 = vmatpush3.bf16.xpose.msra.mxu1 %v983_v36 }
 0x2ba   : > { %1619 = vmatpush3.bf16.msra.mxu0 %v1051_v38  ;;  %1600 = vmatprep.subr.bf16.mxu1 %v2107_v50 }
 0x2bb   : > { %1620 = vmatprep.subr.bf16.mxu0 %v2107_v50 }
 0x2bc   : > { %v967_v39 = vpop.f32.mrb[44].mxu0 }
 0x2bd   : > { %v969_v40 = vpop.f32.mrb[45].mxu0 }
 0x2be   : > { %v971_v41 = vpop.f32.mrb[46].mxu0 }
 0x2bf   : > { %v984_v42 = vpack.c.bf16 %v971_v41, %v967_v39  ;;  %v973_v43 = vpop.f32.mrb[47].mxu0 }
 0x2c0   : > { %v1052_v44 = vpack.c.bf16 %v973_v43, %v969_v40 }
 0x2c1   : > { %1601 = vmatpush3.bf16.xpose.msra.mxu1 %v984_v42 }
 0x2c2   : > { %1621 = vmatpush3.bf16.msra.mxu0 %v1052_v44 }
 0x2c8   : > { %1603 = vmatmul.mubr.bf16.vlgmr.msra.gmra.mrb[4].mxu1 %v976_v61 }
 0x39b   : > { %v1019_v45 = vpop.f32.mrb[4].mxu1 }
 0x39c   : > { %1026 = vmax.xlane.f32.xlu0 %v1019_v45  ;;  %v1604_v46 = vpop.f32.mrb[5].mxu1 }
 0x39d   : > { %v1022_v47 = vpop.f32.mrb[6].mxu1 }
 0x39e   : > { %v1605_v49 = vpop.f32.mrb[7].mxu1 }
 0x3a0   : > { %1028 = vmax.xlane.f32.xlu0 %v1022_v47 }
 0x429   : > { %v1027_v51 = vpop.xlane.xlu0 %1026 }
 0x42a   : > { %v1030_v50 = vsub.f32 %v1019_v45, %v1027_v51 }
 0x42c   : > { %v1032_v52 = vmul.f32 1.442695, %v1030_v50 }
 0x42d   : > { %v1029_v53 = vpop.xlane.xlu0 %1028 }
 0x42e   : > { %1822 = vpow2.f32 %v1032_v52  ;;  %v1031_v54 = vsub.f32 %v1022_v47, %v1029_v53 }
 0x430   : > { %v1034_v56 = vmul.f32 1.442695, %v1031_v54 }
 0x432   : > { %1824 = vpow2.f32 %v1034_v56 }
 0x438   : > { %v1823_v57 = vpop.eup %1822 }
 0x439   : > { %1036 = vadd.xlane.f32.xlu1 %v1823_v57 }
 0x43c   : > { %v1825_v60 = vpop.eup %1824 }
 0x43d   : > { %1038 = vadd.xlane.f32.xlu1 %v1825_v60 }
 0x4c6   : > { %v1037_v55 = vpop.xlane.xlu1 %1036 }
 0x4c7   : > { %1826 = vrcp.f32 %v1037_v55 }
 0x4ca   : > { %v1039_v59 = vpop.xlane.xlu1 %1038 }
 0x4cb   : > { %1828 = vrcp.f32 %v1039_v59 }
 0x4d1   : > { %v1827_v61 = vpop.eup %1826 }
 0x4d2   : > { %v1042_v63 = vmul.f32 %v1827_v61, %v1823_v57 }
 0x4d5   : > { %v1829_v62 = vpop.eup %1828 }
 0x4d6   : > { %v1043_v0 = vmul.f32 %v1829_v62, %v1825_v60 }
 0x4d8   : > { %v1044_v1 = vpack.c.bf16 %v1043_v0, %v1042_v63 }
 0x4da   : > { %1623 = vmatmul.mubr.bf16.vlgmr.msra.gmra.mrb[48].mxu0 %v1044_v1 }
 0x5ad   : > { %v1087_v3 = vpop.f32.mrb[48].mxu0 }
 0x5ae   : > { %v1096_v4 = vadd.f32 %v1094_v48, %v1087_v3  ;;  %v1624_v5 = vpop.f32.mrb[49].mxu0 }
 0x5af   : > { %v1090_v6 = vpop.f32.mrb[50].mxu0 }
 0x5b0   : > { %1098 = vst [vmem:[#allocation2] sm:$0xff] %v1096_v4  ;;  %v1097_v7 = vadd.f32 %v1095_v2, %v1090_v6  ;;  %v1625_v8 = vpop.f32.mrb[51].mxu0 }
 0x5b2   : > { %1099 = vst [vmem:[#allocation2 + $0x8] sm:$0xff] %v1097_v7 }
 0x5b3 PF: > { %v1830_v9 = vld [vmem:[%s2456_s3 + $0x4] ss:$8 sps:$4 sm:$0xff]   ;;  %v1832_v10 = vld [vmem:[%s2456_s3] ss:$8 sps:$4 sm:$0xff]   ;;  %v2109_v58 = vmov 0   ;;  %s2828_s19 = sld [smem:[#allocation17_spill]]  ;;  %v1121_v28 = vlaneseq }
 0x5b4   : > { %1243 = vmatprep.mubr.bf16.mxu0 %v2109_v58  ;;  %1211 = vmatprep.subr.bf16.mxu0 %v1830_v9  ;;  %v1833_v11 = vld [vmem:[%s2456_s3 + $0x14] ss:$8 sps:$4 sm:$0xff]   ;;  %v1835_v12 = vld [vmem:[%s2456_s3 + $0x10] ss:$8 sps:$4 sm:$0xff]   ;;  %v1836_v13 = vld [vmem:[%s2456_s3 + $0x24] ss:$8 sps:$4 sm:$0xff]  }
 0x5b5   : > { %1212 = vmatpush1.bf16.msra.mxu0 %v1832_v10  ;;  %v1838_v14 = vld [vmem:[%s2456_s3 + $0x20] ss:$8 sps:$4 sm:$0xff]   ;;  %v1839_v15 = vld [vmem:[%s2456_s3 + $0x34] ss:$8 sps:$4 sm:$0xff]   ;;  %v1841_v16 = vld [vmem:[%s2456_s3 + $0x30] ss:$8 sps:$4 sm:$0xff]  }
 0x5b6   : > { %1213 = vmatprep.subr.bf16.mxu0 %v1833_v11  ;;  %v1842_v17 = vld [vmem:[%s2456_s3 + $0x44] ss:$8 sps:$4 sm:$0xff]   ;;  %v1844_v18 = vld [vmem:[%s2456_s3 + $0x40] ss:$8 sps:$4 sm:$0xff]   ;;  %v1845_v19 = vld [vmem:[%s2456_s3 + $0x54] ss:$8 sps:$4 sm:$0xff]  }
 0x5b7   : > { %v1847_v20 = vld [vmem:[%s2456_s3 + $0x50] ss:$8 sps:$4 sm:$0xff]   ;;  %v1848_v21 = vld [vmem:[%s2456_s3 + $0x64] ss:$8 sps:$4 sm:$0xff]   ;;  %v1850_v22 = vld [vmem:[%s2456_s3 + $0x60] ss:$8 sps:$4 sm:$0xff]  }
 0x5b8   : > { %v1851_v23 = vld [vmem:[%s2456_s3 + $0x74] ss:$8 sps:$4 sm:$0xff]   ;;  %v1853_v24 = vld [vmem:[%s2456_s3 + $0x70] ss:$8 sps:$4 sm:$0xff]   ;;  %v1122_v29 = vshrl.u32 %v1121_v28, 7  ;;  %s1274_s8 = sshll.u32 %s2483_s14, 4  ;;  %s2660_s8 = int_to_ptr.vmem [resolvable:$true] %s1274_s8 }
 0x5b9   : > { %1214 = vmatpush1.bf16.msra.mxu0 %v1835_v12  ;;  %v1100_v25 = vld [vmem:[#allocation2] sm:$0xff]  ;;  %v1101_v26 = vld [vmem:[#allocation2 + $0x8] sm:$0xff]  ;;  %s1484_s15 = sshll.u32 %s2828_s19, 3  ;;  %s2830_s20 = sld [smem:[#allocation33_spill]] }
 0x5ba   : > { %1215 = vmatprep.subr.bf16.mxu0 %v1836_v13  ;;  %v1102_v27 = vpack.c.bf16 %v1101_v26, %v1100_v25  ;;  %v1123_v30 = vsub.s32 0, %v1122_v29  ;;  %v1119_v31 = vld [vmem:[%s428_s24] sm:$0x3]  ;;  %v1127_v32 = vsub.s32 1, %v1122_v29  ;;  %s1271_s3 = sadd.s32 %s1484_s15, %s2467_s0  ;;  %s2831_s0 = sand.u32 1, %s2048_s28  }
 0x5bb   : > { %s1485_s16 = sshll.u32 %s1271_s3, 7  ;;  %s2667_s21 = scalar_lea.sflag [#allocation5], %s2831_s0 }
 0x5bc   : > { %v1124_v33 = vrot.slane %v1119_v31, %v1123_v30  ;;  %v1128_v34 = vrot.slane %v1119_v31, %v1127_v32  ;;  %s1942_s7 = scalar_lea.vmem %s2660_s8, 512  ;;  %p2832_p10 = scmp.ne.s32.totalorder %s2802_s30, 0 }
 0x5bd   : > { %1216 = vmatpush1.bf16.msra.mxu0 %v1838_v14  ;;  %p1943_p9 = scmp.ne.s32.totalorder %s2660_s8, %s1942_s7  ;;  %s2110_s4 = smov [#allocation9]  }
 0x5be   : > { %1217 = vmatprep.subr.bf16.mxu0 %v1839_v15  ;;  %s1946_s13 = sshll.u32 %s2110_s4, 4  ;;  %s1947_s13 = int_to_ptr.vmem [resolvable:$false] %s1946_s13 }
 0x5bf   : > { %s2657_s24 = scalar_lea.hbm %s2830_s20, %s1485_s16  ;;  %p1944_p6 = pnand %p1943_p9, %p2832_p10 }
 0x5c0   : > { %s1948_s2 = scalar_lea.vmem %s1947_s13, 1024  ;;  %p1949_p4 = scmp.lt.s32.totalorder %s2660_s8, %s1947_s13 }
 0x5c1   : > { %1218 = vmatpush1.bf16.msra.mxu0 %v1841_v16  ;;  %p1945_p1 = pneg %p1944_p6  ;;  %p1950_p12 = scmp.lt.s32.totalorder %s1948_s2, %s1942_s7 }
 0x5c2   : > { %1219 = vmatprep.subr.bf16.mxu0 %v1842_v17 }
 0x5c3   : > { %p1951_p8 = por %p1950_p12, %p1949_p4 }
 0x5c5   : > { %1220 = vmatpush1.bf16.msra.mxu0 %v1844_v18  ;;  %p1952_p2 = pnand %p1951_p8, %p1945_p1 }
 0x5c6   : > { %1221 = vmatprep.subr.bf16.mxu0 %v1845_v19 }
 0x5c9   : > { %1222 = vmatpush1.bf16.msra.mxu0 %v1847_v20 }
 0x5ca   : > { %1223 = vmatprep.subr.bf16.mxu0 %v1848_v21 }
 0x5cd   : > { %1224 = vmatpush1.bf16.msra.mxu0 %v1850_v22 }
 0x5ce   : > { %1225 = vmatprep.subr.bf16.mxu0 %v1851_v23 }
 0x5d1   : > { %1226 = vmatpush1.bf16.msra.mxu0 %v1853_v24 }
 0x5d4   : > { %1244 = vmatmul.mubr.bf16.vlgmr.msra.gmra.mrb[0].mxu0 %v1102_v27 }
 0x6a7   : > { %v1245_v35 = vpop.f32.mrb[0].mxu0 }
 0x6a8   : > { %v1246_v36 = vadd.f32 %v1245_v35, %v1124_v33  ;;  %v1247_v37 = vpop.f32.mrb[1].mxu0 }
 0x6a9   : > { %v1248_v38 = vadd.f32 %v1247_v37, %v1128_v34  ;;  %v1249_v39 = vpop.f32.mrb[2].mxu0 }
 0x6aa   : > { %1254 = vst [vmem:[%s2483_s14] sm:$0xff] %v1246_v36  ;;  %v1250_v40 = vadd.f32 %v1249_v39, %v1124_v33  ;;  %v1251_v41 = vpop.f32.mrb[3].mxu0 }
 0x6ab   : > { %1255 = vst [vmem:[%s2483_s14 + $0x8] sm:$0xff] %v1248_v38  ;;  %v1252_v42 = vadd.f32 %v1251_v41, %v1128_v34 }
 0x6ac   : > { %1256 = vst [vmem:[%s2483_s14 + $0x10] sm:$0xff] %v1250_v40 }
 0x6ad   : > { %1257 = vst [vmem:[%s2483_s14 + $0x18] sm:$0xff] %v1252_v42 }
 0x6ae   : > { %1955 = shalt.err (!%p1952_p2)
}
 0x6af   : > { %s1956_s14 = scalar_lea.hbm %s2657_s24, 512  ;;  %s1960_s15 = scalar_lea.hbm %s2830_s20, 2048 }
 0x6b0   : > { %p1957_p0 = scmp.ne.s32.totalorder %s2657_s24, %s1956_s14  ;;  %p1961_p5 = scmp.lt.u32.totalorder %s2657_s24, %s2830_s20 }
 0x6b1   : > { %p1962_p3 = scmp.lt.u32.totalorder %s1960_s15, %s1956_s14  ;;  %p1964_p9 = scmp.lt.u32.totalorder %s1956_s14, %s2657_s24 }
 0x6b2   : > { %p1958_p13 = pnand %p1957_p0, %p2832_p10 }
 0x6b3   : > { %p1963_p11 = por %p1962_p3, %p1961_p5 }
 0x6b4   : > { %p1959_p7 = pneg %p1958_p13 }
 0x6b5   : > { %p1965_p6 = por %p1964_p9, %p1963_p11 }
 0x6b7   : > { %p1966_p1 = pnand %p1965_p6, %p1959_p7 }
 0x6b9   : > { %1969 = shalt.err (!%p1966_p1)
}
 0x6ba   : > { %s2111_s10 = smov 256   ;;  %s2112_s3 = smov 512  }
 0x6bb   : > { %s2113_s16 = smov 16  }
 0x6bc   : > { %1634 = dma.vmem_to_hbm [thread:$0]  (%p2832_p10), %s2660_s8, 512, %s2657_s24, %s2667_s21, %s2111_s10, %s2112_s3, %s2113_s16  }
 0x6bd PF: > { %p1654_p4 = scmp.ge.s32.totalorder %s2096_s18, 2  ;;  %s1289_s11 = sand.u32 1, %s2044_s27  }
 0x6be   : > { %p2833_p12 = scmp.ne.s32.totalorder %s2803_s23, 0  ;;  %s1290_s17 = scalar_lea.sflag [#allocation5], %s1289_s11 }
 0x6c0   : > { %p1648_p8 = pnand %p1654_p4, %p2833_p12 }
 0x6c2   : > { %2039 = dma.done.wait (!%p1648_p8), %s1290_s17, 512  }
 0x6c3   : > { %2041 = vsyncadd (!%p1648_p8), %s1290_s17, 4294966784  ;;  %s25_s18 = sadd.s32 1, %s2096_s18   ;;  %s2835_s30 = sld [smem:[#allocation23_spill]] }
 0x6c4   : > { %p2696_p2 = scmp.ge.s32.totalorder %s25_s18, 6   ;;  %s2836_s8 = sld [smem:[#allocation14_spill]] }
 0x6c5   : > { %s2837_s10 = sld [smem:[#allocation24_spill]]  ;;  %s2838_s24 = sld [smem:[#allocation15_spill]] }
 0x6c6   : > { %s2839_s13 = sld [smem:[#allocation22_spill]]  ;;  %s2840_s14 = sld [smem:[#allocation18_spill]] }
 0x6c7   : > { %s2841_s15 = sld [smem:[#allocation19_spill]]  ;;  %s2842_s16 = sld [smem:[#allocation20_spill]] }
 0x6c8   : > { %s2843_s17 = sld [smem:[#allocation21_spill]]  ;;  %s2844_s27 = smov %s2048_s28 }
 0x6c9   : > { %s2845_s28 = smov %s2052_s29  ;;  %s2846_s29 = smov %s2835_s30 }
 0x6ca   : > { %s2847_s30 = smov %s2060_s9  ;;  %s2848_s9 = smov %s2836_s8 }
 0x6cb   : > { %s2849_s11 = smov %s2072_s12  ;;  %s2850_s12 = smov %s2838_s24 }
 0x6cc   :  { %24 = sbr.rel (!%p2696_p2) target bundleno = 21 (0x15), region = 122 }
 0x6d3   :  { %1295 = vsyncpa [#allocation4], 1 }
 0x6d4   :  { %1297 = vsyncpa [#allocation4 + $0x1], 1 }
 0x6d5   :  { %1298 = vsyncpa [#allocation7], 1 }
 0x6d6   :  { %1299 = vsyncpa [#allocation5], 1 }
 0x6d7   :  { %1301 = vsyncpa [#allocation5 + $0x1], 1 }

</bundles_post_ra>
